<compile_context>
chip_gen: v6e
topology: v6e:2x2x1
jax: 0.10.0
libtpu: 0.0.40
codegen_flags: <defaults>
</compile_context>

<pallas_src>
import functools

import jax
import jax.numpy as jnp
import numpy as np
from jax.experimental import pallas as pl
from jax.experimental.pallas import tpu as pltpu


def _phase_geometry(K, s, p, H, H_out):
    """Polyphase tap geometry for one spatial dim of a transposed conv."""
    pad_c = K - 1 - p                     # conv-form padding of the dilated view
    d0 = [(pad_c - r) % s for r in range(s)]           # first flipped-kernel tap per phase
    base = [(r + d0[r] - pad_c) // s for r in range(s)]  # input offset per phase (exact div)
    n_taps = K // s
    L = max(0, -min(base))                               # left edge pad of original input
    di = [[base[r] + u + L for u in range(n_taps)] for r in range(s)]  # padded-input offsets
    D = max(max(row) for row in di) + 1                  # tap-window extent
    Hp = H_out // s                                      # per-phase output length
    R = max(0, (Hp - 1) + max(base) + (n_taps - 1) - (H - 1))  # right edge pad
    return d0, di, n_taps, L, R, D, Hp


def _make_kernel(cols, W_in, D_h, D_w):
    def kernel(x_ref, w_ref, b_ref, o_ref):
        # x_ref: (1, C_in, S_pad)   flattened, edge-padded NCHW input (one batch)
        # w_ref: (M, Kc)            M = sh*sw*C_out, Kc = D_h*D_w*C_in (resident)
        # b_ref: (M, 1)
        # o_ref: (1, M, cols)       cols = Hp*W_in (spatial on lanes)
        x = x_ref[0]                                   # (C_in, S_pad)
        parts = []
        for di in range(D_h):                          # statically unrolled (im2col build)
            for dj in range(D_w):
                off = di * W_in + dj
                parts.append(x[:, off:off + cols])     # (C_in, cols)
        patch = jnp.concatenate(parts, axis=0)         # (Kc, cols)
        acc = jax.lax.dot_general(                     # ONE fused MXU matmul
            w_ref[...], patch,
            dimension_numbers=(((1,), (0,)), ((), ())),
            preferred_element_type=jnp.float32)        # (M, cols)
        o_ref[0] = (acc + b_ref[...]).astype(o_ref.dtype)
    return kernel


@functools.partial(jax.jit, static_argnames=("stride", "padding"))
def deconv2d_forward(x_nchw, weight_t, bias, *, stride=(2, 2), padding=(1, 1)):
    """ConvTranspose2d forward.

    x_nchw:   (N, C_in, H, W)        PyTorch NCHW input
    weight_t: (C_in, C_out, KH, KW)  PyTorch ConvTranspose2d weight layout
    bias:     (C_out,)
    returns:  (N, C_out, H_out, W_out)
    """
    N, C_in, H, W = x_nchw.shape
    _, C_out, KH, KW = weight_t.shape
    sh, sw = stride
    ph, pw = padding
    H_out = (H - 1) * sh - 2 * ph + KH
    W_out = (W - 1) * sw - 2 * pw + KW

    assert 0 <= ph <= KH - 1 and 0 <= pw <= KW - 1, "padding must be <= kernel_size - 1"
    assert KH % sh == 0 and KW % sw == 0, "kernel_size must be a multiple of stride"
    assert H_out % sh == 0 and W_out % sw == 0

    # ---- polyphase geometry (pure Python, static) ----
    d0h, di_h, nt_h, Lh, Rh, D_h, Hp = _phase_geometry(KH, sh, ph, H, H_out)
    d0w, di_w, nt_w, Lw, Rw, D_w, Wp = _phase_geometry(KW, sw, pw, W, W_out)

    H_in = H + Lh + Rh
    W_in = W + Lw + Rw
    M = sh * sw * C_out                  # fused output rows (phase-major, then C_out)
    Kc = D_h * D_w * C_in                # fused contraction size
    cols = Hp * W_in                     # flattened spatial (garbage cols b>=Wp discarded)

    # ---- weight: build the fused (M, Kc) matmul matrix once (traced, cheap) ----
    # conv-form flipped weight value: Wf[ci, co, dh, dw] = weight_t[ci, co, KH-1-dh, KW-1-dw]
    Wf = jnp.flip(weight_t, axis=(2, 3))
    Wmat = jnp.zeros((sh, sw, C_out, D_h, D_w, C_in), weight_t.dtype)
    for rh in range(sh):
        for rw in range(sw):
            for u in range(nt_h):
                for v in range(nt_w):
                    blk = Wf[:, :, d0h[rh] + sh * u, d0w[rw] + sw * v]      # (C_in, C_out)
                    Wmat = Wmat.at[rh, rw, :, di_h[rh][u], di_w[rw][v], :].set(blk.T)
    Wmat = Wmat.reshape(M, Kc)
    bias_mat = jnp.tile(bias, sh * sw).reshape(M, 1)

    # ---- input: small edge pad + flatten spatial (no dilated intermediate) ----
    xpad = jnp.pad(x_nchw, ((0, 0), (0, 0), (Lh, Rh), (Lw, Rw)))            # (N,C_in,H_in,W_in)
    S = H_in * W_in
    x_flat = xpad.reshape(N, C_in, S)
    S_need = (D_h - 1) * W_in + (D_w - 1) + cols       # max slice end inside the kernel
    S_pad = -(-max(S, S_need) // 128) * 128            # lane-align the flattened spatial
    if S_pad > S:
        x_flat = jnp.pad(x_flat, ((0, 0), (0, 0), (0, S_pad - S)))

    # ---- hot path: Pallas kernel, grid over batch (independent -> "parallel") ----
    kernel = _make_kernel(cols, W_in, D_h, D_w)
    out = pl.pallas_call(
        kernel,
        out_shape=jax.ShapeDtypeStruct((N, M, cols), x_nchw.dtype),
        grid_spec=pltpu.PrefetchScalarGridSpec(
            num_scalar_prefetch=0,
            grid=(N,),
            in_specs=[
                pl.BlockSpec((1, C_in, S_pad), lambda n: (n, 0, 0)),
                pl.BlockSpec((M, Kc), lambda n: (0, 0)),     # resident across grid
                pl.BlockSpec((M, 1), lambda n: (0, 0)),      # resident across grid
            ],
            out_specs=pl.BlockSpec((1, M, cols), lambda n: (n, 0, 0)),
        ),
        compiler_params=pltpu.CompilerParams(
            dimension_semantics=("parallel",)),
    )(x_flat, Wmat, bias_mat)

    # ---- interleave phases back into NCHW (single small output pass) ----
    out = out.reshape(N, sh, sw, C_out, Hp, W_in)[..., :Wp]
    out = jnp.transpose(out, (0, 3, 4, 1, 5, 2))       # (N, C_out, Hp, sh, Wp, sw)
    return out.reshape(N, C_out, H_out, W_out)


def _reference(x_nchw, weight_t, bias, stride, padding):
    """Pure-JAX reference for ConvTranspose2d (correctness check only)."""
    sh, sw = stride
    ph, pw = padding
    KH, KW = weight_t.shape[2], weight_t.shape[3]
    w_oihw = jnp.transpose(jnp.flip(weight_t, axis=(2, 3)), (1, 0, 2, 3))
    y = jax.lax.conv_general_dilated(
        x_nchw, w_oihw,
        window_strides=(1, 1),
        padding=[(KH - 1 - ph, KH - 1 - ph), (KW - 1 - pw, KW - 1 - pw)],
        lhs_dilation=(sh, sw),
        dimension_numbers=("NCHW", "OIHW", "NCHW"),
    )
    return y + bias.reshape(1, -1, 1, 1)


if __name__ == "__main__":
    # Module config: deconv2d(in_channels=4, out_channels=8, padding=1)
    in_channels, out_channels = 4, 8
    kernel_size = (4, 4)
    stride = (2, 2)
    padding = (1, 1)

    key = jax.random.PRNGKey(0)
    kx, kw, kb = jax.random.split(key, 3)

    fan_in = in_channels * kernel_size[0] * kernel_size[1]
    bound = 1.0 / np.sqrt(fan_in)
    weight_t = jax.random.uniform(
        kw, (in_channels, out_channels) + kernel_size,
        minval=-bound, maxval=bound, dtype=jnp.float32)
    bias = jax.random.uniform(
        kb, (out_channels,), minval=-bound, maxval=bound, dtype=jnp.float32)

    x = jax.random.normal(kx, (2, in_channels, 16, 16), dtype=jnp.float32)

    out = deconv2d_forward(x, weight_t, bias, stride=stride, padding=padding)
    out = jax.block_until_ready(out)

    assert out.shape == (2, out_channels, 32, 32), out.shape
    ref = _reference(x, weight_t, bias, stride, padding)
    np.testing.assert_allclose(np.asarray(out), np.asarray(ref), atol=1e-4, rtol=1e-4)

    print("KERNEL_OK")
</pallas_src>

<mosaic_0001>
module attributes {stable_mosaic.version = 11 : i64} {
  func.func @kernel(%arg0: i32, %arg1: memref<1x4x384xf32, #tpu.memory_space<vmem>>, %arg2: memref<32x36xf32, #tpu.memory_space<vmem>>, %arg3: memref<32x1xf32, #tpu.memory_space<vmem>>, %arg4: memref<1x32x288xf32, #tpu.memory_space<vmem>>) attributes {dimension_semantics = [#tpu.dimension_semantics<parallel>], iteration_bounds = array<i64: 2>, scalar_prefetch = 0 : i64, scratch_operands = 0 : i64, tpu.core_type = #tpu.core_type<tc>, window_params = [{transform_indices = @transform_0, window_bounds = array<i64: 1, 4, 384>}, {pipeline_mode = #tpu.pipeline_mode<synchronous>, transform_indices = @transform_1, window_bounds = array<i64: 32, 36>}, {pipeline_mode = #tpu.pipeline_mode<synchronous>, transform_indices = @transform_2, window_bounds = array<i64: 32, 1>}, {transform_indices = @transform_3, window_bounds = array<i64: 1, 32, 288>}]} {
    %c0 = arith.constant 0 : index
    %c0_0 = arith.constant 0 : index
    %c0_1 = arith.constant 0 : index
    %0 = vector.load %arg1[%c0, %c0_0, %c0_1] : memref<1x4x384xf32, #tpu.memory_space<vmem>>, vector<1x4x384xf32>
    %1 = vector.shape_cast %0 : vector<1x4x384xf32> to vector<4x384xf32>
    %2 = vector.extract_strided_slice %1 {offsets = [0, 0], sizes = [4, 288], strides = [1, 1]} : vector<4x384xf32> to vector<4x288xf32>
    %3 = vector.extract_strided_slice %1 {offsets = [0, 1], sizes = [4, 288], strides = [1, 1]} : vector<4x384xf32> to vector<4x288xf32>
    %4 = vector.extract_strided_slice %1 {offsets = [0, 2], sizes = [4, 288], strides = [1, 1]} : vector<4x384xf32> to vector<4x288xf32>
    %5 = vector.extract_strided_slice %1 {offsets = [0, 18], sizes = [4, 288], strides = [1, 1]} : vector<4x384xf32> to vector<4x288xf32>
    %6 = vector.extract_strided_slice %1 {offsets = [0, 19], sizes = [4, 288], strides = [1, 1]} : vector<4x384xf32> to vector<4x288xf32>
    %7 = vector.extract_strided_slice %1 {offsets = [0, 20], sizes = [4, 288], strides = [1, 1]} : vector<4x384xf32> to vector<4x288xf32>
    %8 = vector.extract_strided_slice %1 {offsets = [0, 36], sizes = [4, 288], strides = [1, 1]} : vector<4x384xf32> to vector<4x288xf32>
    %9 = vector.extract_strided_slice %1 {offsets = [0, 37], sizes = [4, 288], strides = [1, 1]} : vector<4x384xf32> to vector<4x288xf32>
    %10 = vector.extract_strided_slice %1 {offsets = [0, 38], sizes = [4, 288], strides = [1, 1]} : vector<4x384xf32> to vector<4x288xf32>
    %11 = tpu.concatenate %2, %3, %4, %5, %6, %7, %8, %9, %10 in 0 : vector<4x288xf32>, vector<4x288xf32>, vector<4x288xf32>, vector<4x288xf32>, vector<4x288xf32>, vector<4x288xf32>, vector<4x288xf32>, vector<4x288xf32>, vector<4x288xf32> -> vector<36x288xf32>
    %c0_2 = arith.constant 0 : index
    %c0_3 = arith.constant 0 : index
    %12 = vector.load %arg2[%c0_2, %c0_3] : memref<32x36xf32, #tpu.memory_space<vmem>>, vector<32x36xf32>
    %cst = arith.constant dense<0.000000e+00> : vector<32x288xf32>
    %13 = tpu.matmul %12, %11, %cst {dimension_numbers = #tpu.dot_dimension_numbers<[1], [0], [0], [1], [0, 0, 1, 1], [], []>} : vector<32x36xf32>, vector<36x288xf32>, vector<32x288xf32> -> vector<32x288xf32>
    %c0_4 = arith.constant 0 : index
    %c0_5 = arith.constant 0 : index
    %14 = vector.load %arg3[%c0_4, %c0_5] : memref<32x1xf32, #tpu.memory_space<vmem>>, vector<32x1xf32>
    %15 = vector.broadcast %14 : vector<32x1xf32> to vector<32x288xf32>
    %16 = arith.addf %13, %15 : vector<32x288xf32>
    %c0_6 = arith.constant 0 : index
    %c0_7 = arith.constant 0 : index
    %c0_8 = arith.constant 0 : index
    %17 = vector.load %arg4[%c0_6, %c0_7, %c0_8] : memref<1x32x288xf32, #tpu.memory_space<vmem>>, vector<1x32x288xf32>
    %18 = vector.shape_cast %17 : vector<1x32x288xf32> to vector<32x288xf32>
    %19 = vector.shape_cast %16 : vector<32x288xf32> to vector<1x32x288xf32>
    tpu.vector_store %arg4[%c0_6, %c0_7, %c0_8], %19 {strides = array<i32>} : memref<1x32x288xf32, #tpu.memory_space<vmem>>, vector<1x32x288xf32>,
    return
  }
  func.func @transform_0(%arg0: i32) -> (i32, i32, i32) {
    %c0_i32 = arith.constant 0 : i32
    %c0_i32_0 = arith.constant 0 : i32
    %c0_i32_1 = arith.constant 0 : i32
    return %arg0, %c0_i32, %c0_i32_0 : i32, i32, i32
  }
  func.func @transform_1(%arg0: i32) -> (i32, i32) {
    %c0_i32 = arith.constant 0 : i32
    %c0_i32_0 = arith.constant 0 : i32
    %c0_i32_1 = arith.constant 0 : i32
    return %c0_i32, %c0_i32_0 : i32, i32
  }
  func.func @transform_2(%arg0: i32) -> (i32, i32) {
    %c0_i32 = arith.constant 0 : i32
    %c0_i32_0 = arith.constant 0 : i32
    %c0_i32_1 = arith.constant 0 : i32
    return %c0_i32, %c0_i32_0 : i32, i32
  }
  func.func @transform_3(%arg0: i32) -> (i32, i32, i32) {
    %c0_i32 = arith.constant 0 : i32
    %c0_i32_0 = arith.constant 0 : i32
    %c0_i32_1 = arith.constant 0 : i32
    return %arg0, %c0_i32, %c0_i32_0 : i32, i32, i32
  }
}

</mosaic_0001>

<bundles_post_ra>
// kernel: tile.8
= control target key start
LH: loop header
LB: loop body
LE: loop exit
PB: predicated region body
PF: predicated region fallthrough
CT: control target
= control target key end

     0   :  { %s22_s0 = inlined_call_operand.vmem [shape: f32[8], index: 0, kind: input, shape index: {}]   ;;  %s23_s1 = inlined_call_operand.vmem [shape: f32[4,8], index: 1, kind: output, shape index: {}]  }
   0x1   :  { %v4_v0 = vld [vmem:[%s22_s0] ss:$0 sm:$0xff] }
   0x2   :  { %5 = vst [vmem:[%s23_s1] sm:$0xf] %v4_v0 }

// kernel: tile.0
= control target key start
LH: loop header
LB: loop body
LE: loop exit
PB: predicated region body
PF: predicated region fallthrough
CT: control target
= control target key end

     0   :  { %s67_s8 = smov 125   ;;  %vm8_vm0 = vcmask 7168   ;;  %s68_s11 = smov 126   ;;  %s118_s0 = inlined_call_operand.vmem [shape: f32[4,8], index: 0, kind: input, shape index: {}]   ;;  %s119_s1 = inlined_call_operand.vmem [shape: f32[32,1], index: 1, kind: output, shape index: {}]  }
   0x1   :  { %v5_v0 = vld [vmem:[%s118_s0] sm:$0xf]  ;;  %s66_s0 = smov 127   ;;  %s69_s12 = smov 124  }
   0x2   :  { %6 = vst [vmem:[#allocation0] sm:$0xf] %v5_v0  ;;  %s70_s13 = smov 123   ;;  %s71_s14 = smov 122  }
   0x3   :  { %s72_s15 = smov 121  }
   0x9   :  { %v10_v1 = vld [vmem:[#allocation0] sm:$0xf]  }
   0xa   :  { %v22_v2 = vld [vmem:[#allocation0] sm:$0xf]   ;;  %11 = vrot.lane.b32.xlu0 %v10_v1, %s66_s0 }
   0xb   :  { %23 = vrot.lane.b32.xlu1 %v22_v2, %s67_s8  ;;  %v16_v3 = vld [vmem:[#allocation0] sm:$0xf]  }
   0xc   :  { %v28_v4 = vld [vmem:[#allocation0] sm:$0xf]  }
   0xd   :  { %v7_v5 = vld [vmem:[#allocation0] sm:$0xf]  }
   0xe   :  { %9 = vst.msk [vmem:[%s119_s1] ss:$8 sm:$0xf] %vm8_vm0, %v7_v5   ;;  %17 = vrot.lane.b32.xlu0 %v16_v3, %s68_s11  ;;  %v34_v6 = vld [vmem:[#allocation0] sm:$0xf]  }
   0xf   :  { %29 = vrot.lane.b32.xlu1 %v28_v4, %s69_s12  ;;  %v40_v7 = vld [vmem:[#allocation0] sm:$0xf]  }
  0x10   :  { %v46_v8 = vld [vmem:[#allocation0] sm:$0xf]  }
  0x12   :  { %35 = vrot.lane.b32.xlu0 %v34_v6, %s70_s13 }
  0x13   :  { %41 = vrot.lane.b32.xlu1 %v40_v7, %s71_s14 }
  0x16   :  { %47 = vrot.lane.b32.xlu0 %v46_v8, %s72_s15 }
  0x7c   :  { %v12_v9 = vpop.permute.xlu0 %11  }
  0x7d   :  { %v24_v10 = vpop.permute.xlu1 %23   ;;  %52 = vst.msk [vmem:[%s119_s1 + $0x1] ss:$8 sm:$0xf] %vm8_vm0, %v12_v9  }
  0x7e   :  { %54 = vst.msk [vmem:[%s119_s1 + $0x3] ss:$8 sm:$0xf] %vm8_vm0, %v24_v10  }
  0x80   :  { %v18_v11 = vpop.permute.xlu0 %17  }
  0x81   :  { %v30_v12 = vpop.permute.xlu1 %29   ;;  %53 = vst.msk [vmem:[%s119_s1 + $0x2] ss:$8 sm:$0xf] %vm8_vm0, %v18_v11  }
  0x82   :  { %55 = vst.msk [vmem:[%s119_s1 + $0x4] ss:$8 sm:$0xf] %vm8_vm0, %v30_v12  }
  0x84   :  { %v36_v13 = vpop.permute.xlu0 %35  }
  0x85   :  { %v42_v14 = vpop.permute.xlu1 %41   ;;  %56 = vst.msk [vmem:[%s119_s1 + $0x5] ss:$8 sm:$0xf] %vm8_vm0, %v36_v13  }
  0x86   :  { %57 = vst.msk [vmem:[%s119_s1 + $0x6] ss:$8 sm:$0xf] %vm8_vm0, %v42_v14  }
  0x88   :  { %v48_v15 = vpop.permute.xlu0 %47  }
  0x89   :  { %58 = vst.msk [vmem:[%s119_s1 + $0x7] ss:$8 sm:$0xf] %vm8_vm0, %v48_v15  }

// kernel: deconv2d_forward.1
= control target key start
LH: loop header
LB: loop body
LE: loop exit
PB: predicated region body
PF: predicated region fallthrough
CT: control target
= control target key end

     0   :  { %s682_s12 = smov 0   ;;  %s810_s0 = inlined_call_operand.vmem [shape: f32[2,4,384], index: 0, kind: input, shape index: {}]   ;;  %s811_s1 = inlined_call_operand.vmem [shape: f32[32,36], index: 1, kind: input, shape index: {}]   ;;  %s812_s2 = inlined_call_operand.vmem [shape: f32[32,1], index: 2, kind: input, shape index: {}]   ;;  %s813_s3 = inlined_call_operand.vmem [shape: f32[2,32,288], index: 3, kind: output, shape index: {}]  }
   0x1 LB: > { %s574_s13 = sadd.s32 4294967295, %s650_s12   ;;  %p578_p0 = scmp.ge.s32.totalorder %s650_s12, 1  ;;  %s650_s12 = sphi %s682_s12, %s13_s12  }
   0x2   : > { %p137_p1 = scmp.lt.s32.totalorder %s650_s12, 3 }
   0x4   : > { %p138_p2 = pnand %p578_p0, %p137_p1 }
   0x5   : > { %p161_p3 = scmp.lt.s32.totalorder (!%p138_p2), %s574_s13, 1  ;;  %s652_s18 = smov (!%p138_p2), 92  }
   0x6   : > { %141 = sbr.rel (%p138_p2) target bundleno = 389 (0x185), region = 32  ;;  %s653_s19 = smov (!%p138_p2), 90  }
   0x7   : > { %s654_s20 = smov (!%p138_p2), 91   ;;  %s655_s21 = smov (!%p138_p2), 109  }
   0x8   : > { %s656_s22 = smov (!%p138_p2), 108   ;;  %s657_s23 = smov (!%p138_p2), 126  }
   0x9   : > { %s658_s24 = smov (!%p138_p2), 110   ;;  %s660_s27 = smov (!%p138_p2), 127  }
   0xb   : > { %s815_s13 = smov (!%p161_p3, %s574_s13), 1  ;;  %v659_v5 = vmov 0.0   ;;  %v726_v6 = vld [vmem:[%s811_s1] sm:$0xff]  ;;  %vm313_vm0 = vcmask 293888   ;;  %v290_v8 = vld [vmem:[%s812_s2 + $0x8] sm:$0xff]  ;;  %v661_v9 = vmov 0  }
   0xc   : > { %s619_s14 = smul.u32 12, %s815_s13  ;;  %396 = vmatprep.mubr.f32.mxu0 %v659_v5  ;;  %613 = vmatprep.mubr.msk.f32.mxu1 %vm313_vm0, %v726_v6  ;;  %v289_v7 = vld [vmem:[%s812_s2] sm:$0xff]  ;;  %v291_v10 = vld [vmem:[%s812_s2 + $0x10] sm:$0xff]  ;;  %v292_v11 = vld [vmem:[%s812_s2 + $0x18] sm:$0xff]  ;;  %vm272_vm1 = vcmask 1043456   ;;  %vm269_vm2 = vcmask 736256  }
   0xd   : > { %639 = vset.pattern.permute.xlu0 %v661_v9  ;;  %640 = vset.pattern.permute.xlu1 %v661_v9  ;;  %vm257_vm3 = vcmask 744448   ;;  %vm245_vm4 = vcmask 752640   ;;  %vm221_vm5 = vcmask 891904   ;;  %vm233_vm6 = vcmask 883712   ;;  %v286_v62 = vld [vmem:[%s811_s1 + $0x8] sm:$0xff] }
   0xe   : > { %s165_s17 = scalar_lea.vmem %s810_s0, %s619_s14  ;;  %vm197_vm7 = vcmask 1031168   ;;  %vm209_vm8 = vcmask 900096   ;;  %vm185_vm9 = vcmask 1039360   ;;  %vm508_vm10 = vcmask 261120  }
   0xf   : > { %v696_v0 = vld [vmem:[%s165_s17 + $0x8] sm:$0xf]  ;;  %v698_v1 = vld [vmem:[%s165_s17] sm:$0xff]  ;;  %s620_s17 = smul.u32 96, %s815_s13 }
  0x10   : > { %243 = vrot.lane.b32.xlu1 %v696_v0, %s652_s18  ;;  %267 = vrot.lane.b32.xlu0 %v696_v0, %s653_s19  ;;  %v704_v2 = vcombine.high %v698_v1, %v698_v1  ;;  %v178_v3 = vcombine.low %v696_v0, %v696_v0  ;;  %v177_v4 = vcombine.low %v698_v1, %v698_v1 }
  0x14   : > { %253 = vrot.lane.b32.xlu0 %v698_v1, %s654_s20  ;;  %241 = vrot.lane.b32.xlu1 %v704_v2, %s652_s18 }
  0x18   : > { %255 = vrot.lane.b32.xlu1 %v178_v3, %s654_s20  ;;  %265 = vrot.lane.b32.xlu0 %v704_v2, %s653_s19 }
  0x1c   : > { %239 = vrot.lane.b32.xlu1 %v698_v1, %s652_s18  ;;  %263 = vrot.lane.b32.xlu0 %v698_v1, %s653_s19 }
  0x20   : > { %217 = vrot.lane.b32.xlu1 %v704_v2, %s655_s21  ;;  %251 = vrot.lane.b32.xlu0 %v177_v4, %s654_s20  ;;  %s789_s20 = scalar_lea.vmem %s813_s3, %s620_s17 }
  0x24   : > { %229 = vrot.lane.b32.xlu1 %v698_v1, %s656_s22  ;;  %219 = vrot.lane.b32.xlu0 %v696_v0, %s655_s21 }
  0x28   : > { %215 = vrot.lane.b32.xlu1 %v698_v1, %s655_s21  ;;  %231 = vrot.lane.b32.xlu0 %v178_v3, %s656_s22 }
  0x2c   : > { %193 = vrot.lane.b32.xlu1 %v704_v2, %s657_s23  ;;  %227 = vrot.lane.b32.xlu0 %v177_v4, %s656_s22 }
  0x30   : > { %205 = vrot.lane.b32.xlu1 %v698_v1, %s658_s24  ;;  %195 = vrot.lane.b32.xlu0 %v696_v0, %s657_s23 }
  0x34   : > { %191 = vrot.lane.b32.xlu1 %v698_v1, %s657_s23  ;;  %207 = vrot.lane.b32.xlu0 %v178_v3, %s658_s24 }
  0x38   : > { %181 = vrot.lane.b32.xlu1 %v698_v1, %s660_s27  ;;  %203 = vrot.lane.b32.xlu0 %v177_v4, %s658_s24 }
  0x3c   : > { %179 = vrot.lane.b32.xlu1 %v177_v4, %s660_s27  ;;  %183 = vrot.lane.b32.xlu0 %v178_v3, %s660_s27  ;;  %v287_v4 = vld [vmem:[%s811_s1 + $0x10] sm:$0xff] }
  0x40   : > { %295 = vperm.xlu0 %639, %v289_v7   ;;  %300 = vperm.xlu1 %640, %v290_v8  }
  0x44   : > { %305 = vperm.xlu1 %640, %v291_v10   ;;  %310 = vperm.xlu0 %639, %v292_v11  }
  0x82   : > { %v244_v12 = vpop.permute.xlu1 %243  ;;  %v268_v13 = vpop.permute.xlu0 %267 }
  0x83   : > { %603 = vmatprep.subr.msk.mxu1 %vm272_vm1, %v268_v13 }
  0x84   : > { %604 = vmatpush3.msk.msra.mxu1 %vm272_vm1, %v268_v13 }
  0x86   : > { %v254_v14 = vpop.permute.xlu0 %253  ;;  %v242_v15 = vpop.permute.xlu1 %241 }
  0x87   : > { %v247_v23 = vsel %vm245_vm4, %v242_v15, %v244_v12 }
  0x8a   : > { %v256_v16 = vpop.permute.xlu1 %255  ;;  %v266_v17 = vpop.permute.xlu0 %265 }
  0x8b   : > { %v271_v18 = vsel %vm269_vm2, %v266_v17, %v268_v13  ;;  %v284_v19 = vsel %vm272_vm1, %v244_v12, %v256_v16  ;;  %v259_v20 = vsel %vm257_vm3, %v254_v14, %v256_v16 }
  0x8c   : > { %581 = vmatprep.subr.msk.mxu0 %vm272_vm1, %v271_v18  ;;  %605 = vmatprep.subr.mxu1 %v284_v19  ;;  %v283_v25 = vsel %vm272_vm1, %v247_v23, %v259_v20 }
  0x8d   : > { %606 = vmatpush3.msra.mxu1 %v284_v19 }
  0x8e   : > { %v240_v21 = vpop.permute.xlu1 %239  ;;  %v264_v22 = vpop.permute.xlu0 %263 }
  0x8f   : > { %v270_v24 = vsel %vm269_vm2, %v264_v22, %v266_v17  ;;  %v246_v28 = vsel %vm245_vm4, %v240_v21, %v242_v15 }
  0x90   : > { %582 = vmatpush1.msk.msra.mxu0 %vm272_vm1, %v270_v24 }
  0x91   : > { %356 = vmatprep.subr.mxu0 %v283_v25 }
  0x92   : > { %v218_v26 = vpop.permute.xlu1 %217  ;;  %v252_v27 = vpop.permute.xlu0 %251 }
  0x93   : > { %v258_v29 = vsel %vm257_vm3, %v252_v27, %v254_v14 }
  0x94   : > { %v282_v30 = vsel %vm272_vm1, %v246_v28, %v258_v29 }
  0x95   : > { %357 = vmatpush1.msra.mxu0 %v282_v30 }
  0x96   : > { %v230_v31 = vpop.permute.xlu1 %229  ;;  %v220_v32 = vpop.permute.xlu0 %219 }
  0x97   : > { %v223_v35 = vsel %vm221_vm5, %v218_v26, %v220_v32 }
  0x9a   : > { %v216_v33 = vpop.permute.xlu1 %215  ;;  %v232_v34 = vpop.permute.xlu0 %231 }
  0x9b   : > { %v235_v36 = vsel %vm233_vm6, %v230_v31, %v232_v34  ;;  %v281_v37 = vsel %vm272_vm1, %v220_v32, %v232_v34  ;;  %v222_v41 = vsel %vm221_vm5, %v216_v33, %v218_v26 }
  0x9c   : > { %607 = vmatprep.subr.mxu1 %v281_v37  ;;  %v280_v38 = vsel %vm272_vm1, %v223_v35, %v235_v36 }
  0x9d   : > { %358 = vmatprep.subr.mxu0 %v280_v38  ;;  %608 = vmatpush3.msra.mxu1 %v281_v37 }
  0x9e   : > { %v194_v39 = vpop.permute.xlu1 %193  ;;  %v228_v40 = vpop.permute.xlu0 %227 }
  0x9f   : > { %v234_v42 = vsel %vm233_vm6, %v228_v40, %v230_v31 }
  0xa0   : > { %v279_v43 = vsel %vm272_vm1, %v222_v41, %v234_v42 }
  0xa1   : > { %359 = vmatpush1.msra.mxu0 %v279_v43 }
  0xa2   : > { %v206_v44 = vpop.permute.xlu1 %205  ;;  %v196_v45 = vpop.permute.xlu0 %195 }
  0xa3   : > { %v199_v48 = vsel %vm197_vm7, %v194_v39, %v196_v45 }
  0xa6   : > { %v192_v46 = vpop.permute.xlu1 %191  ;;  %v208_v47 = vpop.permute.xlu0 %207 }
  0xa7   : > { %v211_v49 = vsel %vm209_vm8, %v206_v44, %v208_v47  ;;  %v278_v50 = vsel %vm272_vm1, %v196_v45, %v208_v47  ;;  %v198_v54 = vsel %vm197_vm7, %v192_v46, %v194_v39 }
  0xa8   : > { %609 = vmatprep.subr.mxu1 %v278_v50  ;;  %v277_v51 = vsel %vm272_vm1, %v199_v48, %v211_v49 }
  0xa9   : > { %360 = vmatprep.subr.mxu0 %v277_v51  ;;  %610 = vmatpush3.msra.mxu1 %v278_v50 }
  0xaa   : > { %v182_v52 = vpop.permute.xlu1 %181  ;;  %v204_v53 = vpop.permute.xlu0 %203 }
  0xab   : > { %v210_v55 = vsel %vm209_vm8, %v204_v53, %v206_v44 }
  0xac   : > { %v276_v56 = vsel %vm272_vm1, %v198_v54, %v210_v55 }
  0xad   : > { %361 = vmatpush1.msra.mxu0 %v276_v56 }
  0xae   : > { %v180_v57 = vpop.permute.xlu1 %179  ;;  %v184_v58 = vpop.permute.xlu0 %183 }
  0xaf   : > { %v186_v59 = vsel %vm185_vm9, %v180_v57, %v182_v52  ;;  %v187_v60 = vsel %vm185_vm9, %v182_v52, %v184_v58  ;;  %v275_v61 = vsel %vm272_vm1, %v696_v0, %v184_v58  ;;  %v288_v0 = vld [vmem:[%s811_s1 + $0x18] sm:$0xff] }
  0xb0   : > { %611 = vmatprep.subr.mxu1 %v275_v61  ;;  %v274_v63 = vsel %vm272_vm1, %v704_v2, %v187_v60  ;;  %v273_v3 = vsel %vm272_vm1, %v698_v1, %v186_v59 }
  0xb1   : > { %362 = vmatprep.subr.mxu0 %v274_v63  ;;  %612 = vmatpush3.msra.mxu1 %v275_v61 }
  0xb2   : > { %363 = vmatpush1.msra.mxu0 %v273_v3  ;;  %614 = vmatmul.mubr.msk.f32.vlgmr.msra.gmra.mxu1 %vm313_vm0, %v286_v62 }
  0xb3   : > { %583 = vmatmul.mubr.msk.f32.vlgmr.msra.gmra.mxu0 %vm313_vm0, %v726_v6  ;;  %616 = vmatprep.mubr.msk.f32.mxu1 %vm313_vm0, %v287_v4 }
  0xb4   : > { %402 = vmatprep.mubr.f32.mxu0 %v659_v5 }
  0xb6   : > { %617 = vmatmul.mubr.msk.f32.gmra.mxu1 %vm313_vm0, %v288_v0 }
  0xb7   : > { %584 = vmatmul.mubr.msk.f32.gmra.mxu0 %vm313_vm0, %v286_v62 }
  0xb8   : > { %408 = vmatprep.mubr.f32.mxu0 %v659_v5 }
  0xbb   : > { %585 = vmatmul.mubr.msk.f32.gmra.mxu0 %vm313_vm0, %v287_v4  ;;  %v296_v1 = vpop.permute.xlu0 %295  ;;  %v301_v2 = vpop.permute.xlu1 %300 }
  0xbc   : > { %414 = vmatprep.mubr.f32.mxu0 %v659_v5 }
  0xbf   : > { %586 = vmatmul.mubr.msk.f32.gmra.mxu0 %vm313_vm0, %v288_v0  ;;  %v311_v10 = vpop.permute.xlu0 %310  ;;  %v306_v18 = vpop.permute.xlu1 %305 }
 0x172   : > { %v615_v6 = vpop.f32.mrf.mxu1 }
 0x173   : > { %v398_v7 = vpop.f32.mrf.mxu0  ;;  %v493_v8 = vadd.f32 %v615_v6, %v301_v2 }
 0x174   : > { %v399_v9 = vadd.f32 %v398_v7, %v296_v1  ;;  %v487_v5 = vpop.f32.mrf.mxu1 }
 0x175   : > { %v400_v11 = vpop.f32.mrf.mxu0  ;;  %512 = vst.msk [vmem:[%s789_s20 + $0x28] sm:$0xff] %vm508_vm10, %v493_v8  ;;  %v488_v12 = vadd.f32 %v487_v5, %v296_v1 }
 0x176   : > { %506 = vst [vmem:[%s789_s20] sm:$0xff] %v399_v9  ;;  %v401_v13 = vadd.f32 %v400_v11, %v296_v1  ;;  %v618_v14 = vpop.f32.mrf.mxu1 }
 0x177   : > { %v404_v15 = vpop.f32.mrf.mxu0  ;;  %509 = vst.msk [vmem:[%s789_s20 + $0x10] sm:$0xff] %vm508_vm10, %v488_v12  ;;  %v503_v16 = vadd.f32 %v618_v14, %v311_v10 }
 0x178   : > { %507 = vst [vmem:[%s789_s20 + $0x8] sm:$0xff] %v401_v13  ;;  %v405_v17 = vadd.f32 %v404_v15, %v301_v2  ;;  %v497_v19 = vpop.f32.mrf.mxu1 }
 0x179   : > { %v406_v20 = vpop.f32.mrf.mxu0  ;;  %v498_v21 = vadd.f32 %v497_v19, %v306_v18  ;;  %518 = vst.msk [vmem:[%s789_s20 + $0x58] sm:$0xff] %vm508_vm10, %v503_v16 }
 0x17a   : > { %510 = vst [vmem:[%s789_s20 + $0x18] sm:$0xff] %v405_v17  ;;  %v407_v22 = vadd.f32 %v406_v20, %v301_v2 }
 0x17b   : > { %v410_v23 = vpop.f32.mrf.mxu0  ;;  %515 = vst.msk [vmem:[%s789_s20 + $0x40] sm:$0xff] %vm508_vm10, %v498_v21 }
 0x17c   : > { %511 = vst [vmem:[%s789_s20 + $0x20] sm:$0xff] %v407_v22  ;;  %v411_v24 = vadd.f32 %v410_v23, %v306_v18 }
 0x17d   : > { %v412_v25 = vpop.f32.mrf.mxu0 }
 0x17e   : > { %513 = vst [vmem:[%s789_s20 + $0x30] sm:$0xff] %v411_v24  ;;  %v413_v26 = vadd.f32 %v412_v25, %v306_v18 }
 0x17f   : > { %v416_v27 = vpop.f32.mrf.mxu0 }
 0x180   : > { %514 = vst [vmem:[%s789_s20 + $0x38] sm:$0xff] %v413_v26  ;;  %v417_v28 = vadd.f32 %v416_v27, %v311_v10 }
 0x181   : > { %v418_v29 = vpop.f32.mrf.mxu0 }
 0x182   : > { %516 = vst [vmem:[%s789_s20 + $0x48] sm:$0xff] %v417_v28  ;;  %v419_v30 = vadd.f32 %v418_v29, %v311_v10 }
 0x184   : > { %517 = vst [vmem:[%s789_s20 + $0x50] sm:$0xff] %v419_v30 }
 0x185 PF: > { %s13_s12 = sadd.s32 1, %s650_s12  }
 0x186   : > { %p10_p4 = scmp.ge.s32.totalorder %s13_s12, 4  }
 0x188   :  { %12 = sbr.rel (!%p10_p4) target bundleno = 1 (0x1), region = 62 }

</bundles_post_ra>
